<compile_context>
chip_gen: v7x
topology: tpu7x:2x2x1
jax: 0.10.0
libtpu: 0.0.40
codegen_flags: <defaults>
</compile_context>

<pallas_src>
import functools

import jax
import jax.numpy as jnp
import numpy as np
from jax.experimental import pallas as pl
from jax.experimental.pallas import tpu as pltpu

NEG_SLOPE = 0.01              # nn.LeakyReLU default negative_slope
BN_EPS = 1e-5
MXU_DTYPE = jnp.bfloat16      # dtype fed to the MXU; set to jnp.float32 for
                              # bit-exact f32 convolutions (slower MXU path)


def _leaky(v):
    return jnp.where(v > 0, v, NEG_SLOPE * v)


# ---------------------------------------------------------------------------
# Fused kernel: whole forward for one image, entirely in VMEM.
# ---------------------------------------------------------------------------
def _fused_kernel(x_ref, band1_ref, band2_ref, band3_ref,
                  bias1_ref, bias2_ref, bias3_ref,
                  fm_ref, attn_ref, out_ref,
                  pad0_ref, pad1_ref, pad2_ref,
                  *, H, W, M):
    """Layout: activations are 2-D channel-major lane-dense (H, C*W), column
    index = c*W + w.  pad*_ref are (H+2, C*W) scratch buffers whose first and
    last rows are the zero halo for the 3x3 conv in H; the W-direction zero
    padding is folded into the band matrices."""

    def set_padded(pad_ref, act_f32):
        zero_row = jnp.zeros((1, pad_ref.shape[1]), pad_ref.dtype)
        pad_ref[pl.ds(0, 1), :] = zero_row          # top halo row
        pad_ref[pl.ds(H + 1, 1), :] = zero_row      # bottom halo row
        pad_ref[pl.ds(1, H), :] = act_f32.astype(pad_ref.dtype)

    def conv3x3(pad_ref, band_ref, bias_ref):
        # y[h, co*W+wo] = sum_dy  pad[h+dy, :] @ band[dy]   (+ per-channel bias)
        acc = jnp.dot(pad_ref[pl.ds(0, H), :], band_ref[0],
                      preferred_element_type=jnp.float32)
        for dy in (1, 2):                           # static unroll: 3 MXU calls
            acc = acc + jnp.dot(pad_ref[pl.ds(dy, H), :], band_ref[dy],
                                preferred_element_type=jnp.float32)
        return acc + bias_ref[...]                  # (1, C*W) f32 broadcast

    x = x_ref[0]                                    # (H, Cin*W) f32

    # stage 1: conv1 + BN1 + LeakyReLU  -> feature_map
    set_padded(pad0_ref, x)
    y1 = _leaky(conv3x3(pad0_ref, band1_ref, bias1_ref))
    fm_ref[0] = y1.astype(fm_ref.dtype)

    # stage 2: conv2 + BN2 + LeakyReLU  -> x2 ; attention = first M channels
    set_padded(pad1_ref, y1)
    y2 = _leaky(conv3x3(pad1_ref, band2_ref, bias2_ref))
    attn_ref[0] = y2[:, :M * W].astype(attn_ref.dtype)   # channels [0, M)

    # stage 3: conv3 + BN3, residual add with the (f32) input, LeakyReLU
    set_padded(pad2_ref, y2)
    y3 = conv3x3(pad2_ref, band3_ref, bias3_ref)
    out_ref[0] = _leaky(x + y3).astype(out_ref.dtype)


# ---------------------------------------------------------------------------
# Wrapper (NCHW in / NCHW out, matching the PyTorch module)
# ---------------------------------------------------------------------------
def lightweight_forward(x_nchw, prepared, M):
    band1, bias1, band2, bias2, band3, bias3 = prepared
    N, Cin, H, W = x_nchw.shape
    C1 = band1.shape[-1] // W
    C2 = band2.shape[-1] // W

    # NCHW -> channel-major lane-dense (N, H, C*W); pure layout plumbing.
    x_cd = jnp.transpose(x_nchw, (0, 2, 1, 3)).reshape(N, H, Cin * W)

    kernel = functools.partial(_fused_kernel, H=H, W=W, M=M)
    fm_cd, attn_cd, out_cd = pl.pallas_call(
        kernel,
        out_shape=(
            jax.ShapeDtypeStruct((N, H, C1 * W), jnp.float32),
            jax.ShapeDtypeStruct((N, H, M * W), jnp.float32),
            jax.ShapeDtypeStruct((N, H, Cin * W), jnp.float32),
        ),
        grid=(N,),
        in_specs=[
            pl.BlockSpec((1, H, Cin * W), lambda n: (n, 0, 0)),
            pl.BlockSpec((3, Cin * W, C1 * W), lambda n: (0, 0, 0)),
            pl.BlockSpec((3, C1 * W, C2 * W), lambda n: (0, 0, 0)),
            pl.BlockSpec((3, C2 * W, Cin * W), lambda n: (0, 0, 0)),
            pl.BlockSpec((1, C1 * W), lambda n: (0, 0)),
            pl.BlockSpec((1, C2 * W), lambda n: (0, 0)),
            pl.BlockSpec((1, Cin * W), lambda n: (0, 0)),
        ],
        out_specs=(
            pl.BlockSpec((1, H, C1 * W), lambda n: (n, 0, 0)),
            pl.BlockSpec((1, H, M * W), lambda n: (n, 0, 0)),
            pl.BlockSpec((1, H, Cin * W), lambda n: (n, 0, 0)),
        ),
        scratch_shapes=[
            pltpu.VMEM((H + 2, Cin * W), MXU_DTYPE),   # padded x
            pltpu.VMEM((H + 2, C1 * W), MXU_DTYPE),    # padded feature_map
            pltpu.VMEM((H + 2, C2 * W), MXU_DTYPE),    # padded x2
        ],
        compiler_params=pltpu.CompilerParams(
            dimension_semantics=("parallel",)),
    )(x_cd, band1, band2, band3, bias1, bias2, bias3)

    def to_nchw(t_cd, C):
        return jnp.transpose(t_cd.reshape(N, H, C, W), (0, 2, 1, 3))

    return to_nchw(fm_cd, C1), to_nchw(attn_cd, M), to_nchw(out_cd, Cin)


# ---------------------------------------------------------------------------
# Host-side parameter preparation
# ---------------------------------------------------------------------------
def make_params(key, cin, c1, c2):
    """Deterministic conv + BN parameters, folded to (weight, bias) per stage.

    Returns [(w, b)] * 3 with w of shape (3, 3, Ci, Co) (BN scale folded in)
    and b of shape (Co,) = beta + scale * (conv_bias - running_mean)."""

    def conv_bn(k, ci, co):
        kw, kb, kg, kbeta, km, kv = jax.random.split(k, 6)
        w = (0.1 * jax.random.normal(kw, (3, 3, ci, co))).astype(jnp.float32)
        conv_b = 0.1 * jax.random.normal(kb, (co,))
        gamma = 1.0 + 0.1 * jax.random.normal(kg, (co,))
        beta = 0.1 * jax.random.normal(kbeta, (co,))
        run_mean = 0.1 * jax.random.normal(km, (co,))
        run_var = jnp.abs(jax.random.normal(kv, (co,))) + 0.5
        scale = gamma / jnp.sqrt(run_var + BN_EPS)
        w_folded = (w * scale).astype(jnp.float32)           # fold BN scale
        bias = (beta + scale * (conv_b - run_mean)).astype(jnp.float32)
        return w_folded, bias

    k1, k2, k3 = jax.random.split(key, 3)
    return [conv_bn(k1, cin, c1),    # conv1: cin -> c1
            conv_bn(k2, c1, c2),     # conv2: c1  -> c2
            conv_bn(k3, c2, cin)]    # conv3: c2  -> cin (residual with input)


def _make_band(w_folded, W):
    """(3,3,Ci,Co) weights -> (3, Ci*W, Co*W) channel-major Toeplitz bands.

    band[dy, ci*W + wi, co*W + wo] = w[dy, wi-wo+1, ci, co] when |wi-wo| <= 1;
    the implicit zeros encode the W-direction 'same' padding."""
    wf = np.asarray(w_folded, np.float32)
    _, _, ci, co = wf.shape
    band = np.zeros((3, ci * W, co * W), np.float32)
    for dy in range(3):
        for dx in range(3):
            for wo in range(W):
                wi = wo + dx - 1
                if 0 <= wi < W:
                    band[dy, wi::W, wo::W] = wf[dy, dx]
    return band


def prepare_params(folded_params, W):
    """Band matrices (MXU dtype) + lane-tiled per-channel biases (f32)."""
    prepared = []
    for w, b in folded_params:
        band = jnp.asarray(_make_band(w, W), MXU_DTYPE)
        bias_row = jnp.asarray(np.repeat(np.asarray(b, np.float32), W),
                               jnp.float32).reshape(1, -1)
        prepared.extend([band, bias_row])
    return tuple(prepared)


# ---------------------------------------------------------------------------
# Pure-JAX reference (emulates the kernel's bf16 MXU quantization)
# ---------------------------------------------------------------------------
def _ref_forward(x_nchw, folded_params, M):
    q = lambda t: t.astype(MXU_DTYPE).astype(jnp.float32)
    leaky = lambda v: jnp.where(v > 0, v, NEG_SLOPE * v)

    def conv(inp, w, b):
        y = jax.lax.conv_general_dilated(
            q(inp), q(w), window_strides=(1, 1), padding="SAME",
            dimension_numbers=("NHWC", "HWIO", "NHWC"),
            precision=jax.lax.Precision.HIGHEST)
        return y + b

    (w1, b1), (w2, b2), (w3, b3) = folded_params
    x = jnp.transpose(x_nchw, (0, 2, 3, 1))
    fm = leaky(conv(x, w1, b1))
    x2 = leaky(conv(fm, w2, b2))
    attn = x2[..., :M]
    out = leaky(x + conv(x2, w3, b3))
    to_nchw = lambda t: jnp.transpose(t, (0, 3, 1, 2))
    return to_nchw(fm), to_nchw(attn), to_nchw(out)


if __name__ == "__main__":
    N, CIN, H, W = 2, 4, 16, 16
    C1, C2 = 8, 8
    M = 4

    key = jax.random.PRNGKey(0)
    kx, kp = jax.random.split(key)
    x = jax.random.normal(kx, (N, CIN, H, W), jnp.float32)

    folded = make_params(kp, CIN, C1, C2)      # conv+BN folded (w, bias) per stage
    prepared = prepare_params(folded, W)       # band matrices + tiled biases

    fwd = jax.jit(functools.partial(lightweight_forward, M=M))
    feature_map, attention_map, out = fwd(x, prepared)
    jax.block_until_ready((feature_map, attention_map, out))

    assert feature_map.shape == (N, C1, H, W)
    assert attention_map.shape == (N, M, H, W)
    assert out.shape == (N, CIN, H, W)

    # numerical self-check against a pure-JAX reference with the same bf16
    # quantization at the MXU boundaries (exact up to f32 accumulation order).
    ref_fm, ref_attn, ref_out = _ref_forward(x, folded, M)
    np.testing.assert_allclose(feature_map, ref_fm, rtol=2e-3, atol=2e-3)
    np.testing.assert_allclose(attention_map, ref_attn, rtol=2e-3, atol=2e-3)
    np.testing.assert_allclose(out, ref_out, rtol=2e-3, atol=2e-3)

    print("KERNEL_OK")
</pallas_src>

<mosaic_0001>
module attributes {stable_mosaic.version = 11 : i64} {
  func.func @_fused_kernel(%arg0: i32, %arg1: memref<1x16x64xf32, #tpu.memory_space<vmem>>, %arg2: memref<3x64x128xbf16, #tpu.memory_space<vmem>>, %arg3: memref<3x128x128xbf16, #tpu.memory_space<vmem>>, %arg4: memref<3x128x64xbf16, #tpu.memory_space<vmem>>, %arg5: memref<1x128xf32, #tpu.memory_space<vmem>>, %arg6: memref<1x128xf32, #tpu.memory_space<vmem>>, %arg7: memref<1x64xf32, #tpu.memory_space<vmem>>, %arg8: memref<1x16x128xf32, #tpu.memory_space<vmem>>, %arg9: memref<1x16x64xf32, #tpu.memory_space<vmem>>, %arg10: memref<1x16x64xf32, #tpu.memory_space<vmem>>, %arg11: memref<18x64xbf16, #tpu.memory_space<vmem>>, %arg12: memref<18x128xbf16, #tpu.memory_space<vmem>>, %arg13: memref<18x128xbf16, #tpu.memory_space<vmem>>) attributes {dimension_semantics = [#tpu.dimension_semantics<parallel>], iteration_bounds = array<i64: 2>, scalar_prefetch = 0 : i64, scratch_operands = 3 : i64, tpu.core_type = #tpu.core_type<tc>, window_params = [{transform_indices = @transform_0, window_bounds = array<i64: 1, 16, 64>}, {pipeline_mode = #tpu.pipeline_mode<synchronous>, transform_indices = @transform_1, window_bounds = array<i64: 3, 64, 128>}, {pipeline_mode = #tpu.pipeline_mode<synchronous>, transform_indices = @transform_2, window_bounds = array<i64: 3, 128, 128>}, {pipeline_mode = #tpu.pipeline_mode<synchronous>, transform_indices = @transform_3, window_bounds = array<i64: 3, 128, 64>}, {pipeline_mode = #tpu.pipeline_mode<synchronous>, transform_indices = @transform_4, window_bounds = array<i64: 1, 128>}, {pipeline_mode = #tpu.pipeline_mode<synchronous>, transform_indices = @transform_5, window_bounds = array<i64: 1, 128>}, {pipeline_mode = #tpu.pipeline_mode<synchronous>, transform_indices = @transform_6, window_bounds = array<i64: 1, 64>}, {transform_indices = @transform_7, window_bounds = array<i64: 1, 16, 128>}, {transform_indices = @transform_8, window_bounds = array<i64: 1, 16, 64>}, {transform_indices = @transform_9, window_bounds = array<i64: 1, 16, 64>}]} {
    %c0 = arith.constant 0 : index
    %c0_0 = arith.constant 0 : index
    %c0_1 = arith.constant 0 : index
    %0 = vector.load %arg1[%c0, %c0_0, %c0_1] : memref<1x16x64xf32, #tpu.memory_space<vmem>>, vector<1x16x64xf32>
    %1 = vector.shape_cast %0 : vector<1x16x64xf32> to vector<16x64xf32>
    %cst = arith.constant 0.000000e+00 : bf16
    %2 = vector.broadcast %cst : bf16 to vector<1x64xbf16>
    %c0_2 = arith.constant 0 : index
    %c0_3 = arith.constant 0 : index
    %3 = vector.load %arg11[%c0_2, %c0_3] : memref<18x64xbf16, #tpu.memory_space<vmem>>, vector<1x64xbf16>
    tpu.vector_store %arg11[%c0_2, %c0_3], %2 {strides = array<i32>} : memref<18x64xbf16, #tpu.memory_space<vmem>>, vector<1x64xbf16>,
    %c17 = arith.constant 17 : index
    %c0_4 = arith.constant 0 : index
    %4 = vector.load %arg11[%c17, %c0_4] : memref<18x64xbf16, #tpu.memory_space<vmem>>, vector<1x64xbf16>
    tpu.vector_store %arg11[%c17, %c0_4], %2 {strides = array<i32>} : memref<18x64xbf16, #tpu.memory_space<vmem>>, vector<1x64xbf16>,
    %5 = arith.truncf %1 : vector<16x64xf32> to vector<16x64xbf16>
    %c1 = arith.constant 1 : index
    %c0_5 = arith.constant 0 : index
    %6 = vector.load %arg11[%c1, %c0_5] : memref<18x64xbf16, #tpu.memory_space<vmem>>, vector<16x64xbf16>
    tpu.vector_store %arg11[%c1, %c0_5], %5 {strides = array<i32>} : memref<18x64xbf16, #tpu.memory_space<vmem>>, vector<16x64xbf16>,
    %c0_6 = arith.constant 0 : index
    %c0_7 = arith.constant 0 : index
    %7 = vector.load %arg11[%c0_6, %c0_7] : memref<18x64xbf16, #tpu.memory_space<vmem>>, vector<16x64xbf16>
    %c0_8 = arith.constant 0 : index
    %c0_9 = arith.constant 0 : index
    %c0_10 = arith.constant 0 : index
    %8 = vector.load %arg2[%c0_8, %c0_9, %c0_10] : memref<3x64x128xbf16, #tpu.memory_space<vmem>>, vector<1x64x128xbf16>
    %9 = vector.shape_cast %8 : vector<1x64x128xbf16> to vector<64x128xbf16>
    %cst_11 = arith.constant dense<0.000000e+00> : vector<16x128xf32>
    %10 = tpu.matmul %7, %9, %cst_11 {dimension_numbers = #tpu.dot_dimension_numbers<[1], [0], [0], [1], [0, 0, 1, 1], [], []>} : vector<16x64xbf16>, vector<64x128xbf16>, vector<16x128xf32> -> vector<16x128xf32>
    %c1_12 = arith.constant 1 : index
    %c0_13 = arith.constant 0 : index
    %11 = vector.load %arg11[%c1_12, %c0_13] : memref<18x64xbf16, #tpu.memory_space<vmem>>, vector<16x64xbf16>
    %c1_14 = arith.constant 1 : index
    %c0_15 = arith.constant 0 : index
    %c0_16 = arith.constant 0 : index
    %12 = vector.load %arg2[%c1_14, %c0_15, %c0_16] : memref<3x64x128xbf16, #tpu.memory_space<vmem>>, vector<1x64x128xbf16>
    %13 = vector.shape_cast %12 : vector<1x64x128xbf16> to vector<64x128xbf16>
    %cst_17 = arith.constant dense<0.000000e+00> : vector<16x128xf32>
    %14 = tpu.matmul %11, %13, %cst_17 {dimension_numbers = #tpu.dot_dimension_numbers<[1], [0], [0], [1], [0, 0, 1, 1], [], []>} : vector<16x64xbf16>, vector<64x128xbf16>, vector<16x128xf32> -> vector<16x128xf32>
    %15 = arith.addf %10, %14 : vector<16x128xf32>
    %c2 = arith.constant 2 : index
    %c0_18 = arith.constant 0 : index
    %16 = vector.load %arg11[%c2, %c0_18] : memref<18x64xbf16, #tpu.memory_space<vmem>>, vector<16x64xbf16>
    %c2_19 = arith.constant 2 : index
    %c0_20 = arith.constant 0 : index
    %c0_21 = arith.constant 0 : index
    %17 = vector.load %arg2[%c2_19, %c0_20, %c0_21] : memref<3x64x128xbf16, #tpu.memory_space<vmem>>, vector<1x64x128xbf16>
    %18 = vector.shape_cast %17 : vector<1x64x128xbf16> to vector<64x128xbf16>
    %cst_22 = arith.constant dense<0.000000e+00> : vector<16x128xf32>
    %19 = tpu.matmul %16, %18, %cst_22 {dimension_numbers = #tpu.dot_dimension_numbers<[1], [0], [0], [1], [0, 0, 1, 1], [], []>} : vector<16x64xbf16>, vector<64x128xbf16>, vector<16x128xf32> -> vector<16x128xf32>
    %20 = arith.addf %15, %19 : vector<16x128xf32>
    %c0_23 = arith.constant 0 : index
    %c0_24 = arith.constant 0 : index
    %21 = vector.load %arg5[%c0_23, %c0_24] : memref<1x128xf32, #tpu.memory_space<vmem>>, vector<1x128xf32>
    %22 = vector.broadcast %21 : vector<1x128xf32> to vector<16x128xf32>
    %23 = arith.addf %20, %22 : vector<16x128xf32>
    %cst_25 = arith.constant 0.000000e+00 : f32
    %24 = vector.broadcast %cst_25 : f32 to vector<16x128xf32>
    %25 = arith.cmpf ogt, %23, %24 : vector<16x128xf32>
    %cst_26 = arith.constant 0.00999999977 : f32
    %26 = vector.broadcast %cst_26 : f32 to vector<16x128xf32>
    %27 = arith.mulf %26, %23 : vector<16x128xf32>
    %28 = arith.select %25, %23, %27 : vector<16x128xi1>, vector<16x128xf32>
    %c0_27 = arith.constant 0 : index
    %c0_28 = arith.constant 0 : index
    %c0_29 = arith.constant 0 : index
    %29 = vector.load %arg8[%c0_27, %c0_28, %c0_29] : memref<1x16x128xf32, #tpu.memory_space<vmem>>, vector<1x16x128xf32>
    %30 = vector.shape_cast %29 : vector<1x16x128xf32> to vector<16x128xf32>
    %31 = vector.shape_cast %28 : vector<16x128xf32> to vector<1x16x128xf32>
    tpu.vector_store %arg8[%c0_27, %c0_28, %c0_29], %31 {strides = array<i32>} : memref<1x16x128xf32, #tpu.memory_space<vmem>>, vector<1x16x128xf32>,
    %cst_30 = arith.constant 0.000000e+00 : bf16
    %32 = vector.broadcast %cst_30 : bf16 to vector<1x128xbf16>
    %c0_31 = arith.constant 0 : index
    %c0_32 = arith.constant 0 : index
    %33 = vector.load %arg12[%c0_31, %c0_32] : memref<18x128xbf16, #tpu.memory_space<vmem>>, vector<1x128xbf16>
    tpu.vector_store %arg12[%c0_31, %c0_32], %32 {strides = array<i32>} : memref<18x128xbf16, #tpu.memory_space<vmem>>, vector<1x128xbf16>,
    %c17_33 = arith.constant 17 : index
    %c0_34 = arith.constant 0 : index
    %34 = vector.load %arg12[%c17_33, %c0_34] : memref<18x128xbf16, #tpu.memory_space<vmem>>, vector<1x128xbf16>
    tpu.vector_store %arg12[%c17_33, %c0_34], %32 {strides = array<i32>} : memref<18x128xbf16, #tpu.memory_space<vmem>>, vector<1x128xbf16>,
    %35 = arith.truncf %28 : vector<16x128xf32> to vector<16x128xbf16>
    %c1_35 = arith.constant 1 : index
    %c0_36 = arith.constant 0 : index
    %36 = vector.load %arg12[%c1_35, %c0_36] : memref<18x128xbf16, #tpu.memory_space<vmem>>, vector<16x128xbf16>
    tpu.vector_store %arg12[%c1_35, %c0_36], %35 {strides = array<i32>} : memref<18x128xbf16, #tpu.memory_space<vmem>>, vector<16x128xbf16>,
    %c0_37 = arith.constant 0 : index
    %c0_38 = arith.constant 0 : index
    %37 = vector.load %arg12[%c0_37, %c0_38] : memref<18x128xbf16, #tpu.memory_space<vmem>>, vector<16x128xbf16>
    %c0_39 = arith.constant 0 : index
    %c0_40 = arith.constant 0 : index
    %c0_41 = arith.constant 0 : index
    %38 = vector.load %arg3[%c0_39, %c0_40, %c0_41] : memref<3x128x128xbf16, #tpu.memory_space<vmem>>, vector<1x128x128xbf16>
    %39 = vector.shape_cast %38 : vector<1x128x128xbf16> to vector<128x128xbf16>
    %cst_42 = arith.constant dense<0.000000e+00> : vector<16x128xf32>
    %40 = tpu.matmul %37, %39, %cst_42 {dimension_numbers = #tpu.dot_dimension_numbers<[1], [0], [0], [1], [0, 0, 1, 1], [], []>} : vector<16x128xbf16>, vector<128x128xbf16>, vector<16x128xf32> -> vector<16x128xf32>
    %c1_43 = arith.constant 1 : index
    %c0_44 = arith.constant 0 : index
    %41 = vector.load %arg12[%c1_43, %c0_44] : memref<18x128xbf16, #tpu.memory_space<vmem>>, vector<16x128xbf16>
    %c1_45 = arith.constant 1 : index
    %c0_46 = arith.constant 0 : index
    %c0_47 = arith.constant 0 : index
    %42 = vector.load %arg3[%c1_45, %c0_46, %c0_47] : memref<3x128x128xbf16, #tpu.memory_space<vmem>>, vector<1x128x128xbf16>
    %43 = vector.shape_cast %42 : vector<1x128x128xbf16> to vector<128x128xbf16>
    %cst_48 = arith.constant dense<0.000000e+00> : vector<16x128xf32>
    %44 = tpu.matmul %41, %43, %cst_48 {dimension_numbers = #tpu.dot_dimension_numbers<[1], [0], [0], [1], [0, 0, 1, 1], [], []>} : vector<16x128xbf16>, vector<128x128xbf16>, vector<16x128xf32> -> vector<16x128xf32>
    %45 = arith.addf %40, %44 : vector<16x128xf32>
    %c2_49 = arith.constant 2 : index
    %c0_50 = arith.constant 0 : index
    %46 = vector.load %arg12[%c2_49, %c0_50] : memref<18x128xbf16, #tpu.memory_space<vmem>>, vector<16x128xbf16>
    %c2_51 = arith.constant 2 : index
    %c0_52 = arith.constant 0 : index
    %c0_53 = arith.constant 0 : index
    %47 = vector.load %arg3[%c2_51, %c0_52, %c0_53] : memref<3x128x128xbf16, #tpu.memory_space<vmem>>, vector<1x128x128xbf16>
    %48 = vector.shape_cast %47 : vector<1x128x128xbf16> to vector<128x128xbf16>
    %cst_54 = arith.constant dense<0.000000e+00> : vector<16x128xf32>
    %49 = tpu.matmul %46, %48, %cst_54 {dimension_numbers = #tpu.dot_dimension_numbers<[1], [0], [0], [1], [0, 0, 1, 1], [], []>} : vector<16x128xbf16>, vector<128x128xbf16>, vector<16x128xf32> -> vector<16x128xf32>
    %50 = arith.addf %45, %49 : vector<16x128xf32>
    %c0_55 = arith.constant 0 : index
    %c0_56 = arith.constant 0 : index
    %51 = vector.load %arg6[%c0_55, %c0_56] : memref<1x128xf32, #tpu.memory_space<vmem>>, vector<1x128xf32>
    %52 = vector.broadcast %51 : vector<1x128xf32> to vector<16x128xf32>
    %53 = arith.addf %50, %52 : vector<16x128xf32>
    %cst_57 = arith.constant 0.000000e+00 : f32
    %54 = vector.broadcast %cst_57 : f32 to vector<16x128xf32>
    %55 = arith.cmpf ogt, %53, %54 : vector<16x128xf32>
    %cst_58 = arith.constant 0.00999999977 : f32
    %56 = vector.broadcast %cst_58 : f32 to vector<16x128xf32>
    %57 = arith.mulf %56, %53 : vector<16x128xf32>
    %58 = arith.select %55, %53, %57 : vector<16x128xi1>, vector<16x128xf32>
    %59 = vector.extract_strided_slice %58 {offsets = [0, 0], sizes = [16, 64], strides = [1, 1]} : vector<16x128xf32> to vector<16x64xf32>
    %c0_59 = arith.constant 0 : index
    %c0_60 = arith.constant 0 : index
    %c0_61 = arith.constant 0 : index
    %60 = vector.load %arg9[%c0_59, %c0_60, %c0_61] : memref<1x16x64xf32, #tpu.memory_space<vmem>>, vector<1x16x64xf32>
    %61 = vector.shape_cast %60 : vector<1x16x64xf32> to vector<16x64xf32>
    %62 = vector.shape_cast %59 : vector<16x64xf32> to vector<1x16x64xf32>
    tpu.vector_store %arg9[%c0_59, %c0_60, %c0_61], %62 {strides = array<i32>} : memref<1x16x64xf32, #tpu.memory_space<vmem>>, vector<1x16x64xf32>,
    %cst_62 = arith.constant 0.000000e+00 : bf16
    %63 = vector.broadcast %cst_62 : bf16 to vector<1x128xbf16>
    %c0_63 = arith.constant 0 : index
    %c0_64 = arith.constant 0 : index
    %64 = vector.load %arg13[%c0_63, %c0_64] : memref<18x128xbf16, #tpu.memory_space<vmem>>, vector<1x128xbf16>
    tpu.vector_store %arg13[%c0_63, %c0_64], %63 {strides = array<i32>} : memref<18x128xbf16, #tpu.memory_space<vmem>>, vector<1x128xbf16>,
    %c17_65 = arith.constant 17 : index
    %c0_66 = arith.constant 0 : index
    %65 = vector.load %arg13[%c17_65, %c0_66] : memref<18x128xbf16, #tpu.memory_space<vmem>>, vector<1x128xbf16>
    tpu.vector_store %arg13[%c17_65, %c0_66], %63 {strides = array<i32>} : memref<18x128xbf16, #tpu.memory_space<vmem>>, vector<1x128xbf16>,
    %66 = arith.truncf %58 : vector<16x128xf32> to vector<16x128xbf16>
    %c1_67 = arith.constant 1 : index
    %c0_68 = arith.constant 0 : index
    %67 = vector.load %arg13[%c1_67, %c0_68] : memref<18x128xbf16, #tpu.memory_space<vmem>>, vector<16x128xbf16>
    tpu.vector_store %arg13[%c1_67, %c0_68], %66 {strides = array<i32>} : memref<18x128xbf16, #tpu.memory_space<vmem>>, vector<16x128xbf16>,
    %c0_69 = arith.constant 0 : index
    %c0_70 = arith.constant 0 : index
    %68 = vector.load %arg13[%c0_69, %c0_70] : memref<18x128xbf16, #tpu.memory_space<vmem>>, vector<16x128xbf16>
    %c0_71 = arith.constant 0 : index
    %c0_72 = arith.constant 0 : index
    %c0_73 = arith.constant 0 : index
    %69 = vector.load %arg4[%c0_71, %c0_72, %c0_73] : memref<3x128x64xbf16, #tpu.memory_space<vmem>>, vector<1x128x64xbf16>
    %70 = vector.shape_cast %69 : vector<1x128x64xbf16> to vector<128x64xbf16>
    %cst_74 = arith.constant dense<0.000000e+00> : vector<16x64xf32>
    %71 = tpu.matmul %68, %70, %cst_74 {dimension_numbers = #tpu.dot_dimension_numbers<[1], [0], [0], [1], [0, 0, 1, 1], [], []>} : vector<16x128xbf16>, vector<128x64xbf16>, vector<16x64xf32> -> vector<16x64xf32>
    %c1_75 = arith.constant 1 : index
    %c0_76 = arith.constant 0 : index
    %72 = vector.load %arg13[%c1_75, %c0_76] : memref<18x128xbf16, #tpu.memory_space<vmem>>, vector<16x128xbf16>
    %c1_77 = arith.constant 1 : index
    %c0_78 = arith.constant 0 : index
    %c0_79 = arith.constant 0 : index
    %73 = vector.load %arg4[%c1_77, %c0_78, %c0_79] : memref<3x128x64xbf16, #tpu.memory_space<vmem>>, vector<1x128x64xbf16>
    %74 = vector.shape_cast %73 : vector<1x128x64xbf16> to vector<128x64xbf16>
    %cst_80 = arith.constant dense<0.000000e+00> : vector<16x64xf32>
    %75 = tpu.matmul %72, %74, %cst_80 {dimension_numbers = #tpu.dot_dimension_numbers<[1], [0], [0], [1], [0, 0, 1, 1], [], []>} : vector<16x128xbf16>, vector<128x64xbf16>, vector<16x64xf32> -> vector<16x64xf32>
    %76 = arith.addf %71, %75 : vector<16x64xf32>
    %c2_81 = arith.constant 2 : index
    %c0_82 = arith.constant 0 : index
    %77 = vector.load %arg13[%c2_81, %c0_82] : memref<18x128xbf16, #tpu.memory_space<vmem>>, vector<16x128xbf16>
    %c2_83 = arith.constant 2 : index
    %c0_84 = arith.constant 0 : index
    %c0_85 = arith.constant 0 : index
    %78 = vector.load %arg4[%c2_83, %c0_84, %c0_85] : memref<3x128x64xbf16, #tpu.memory_space<vmem>>, vector<1x128x64xbf16>
    %79 = vector.shape_cast %78 : vector<1x128x64xbf16> to vector<128x64xbf16>
    %cst_86 = arith.constant dense<0.000000e+00> : vector<16x64xf32>
    %80 = tpu.matmul %77, %79, %cst_86 {dimension_numbers = #tpu.dot_dimension_numbers<[1], [0], [0], [1], [0, 0, 1, 1], [], []>} : vector<16x128xbf16>, vector<128x64xbf16>, vector<16x64xf32> -> vector<16x64xf32>
    %81 = arith.addf %76, %80 : vector<16x64xf32>
    %c0_87 = arith.constant 0 : index
    %c0_88 = arith.constant 0 : index
    %82 = vector.load %arg7[%c0_87, %c0_88] : memref<1x64xf32, #tpu.memory_space<vmem>>, vector<1x64xf32>
    %83 = vector.broadcast %82 : vector<1x64xf32> to vector<16x64xf32>
    %84 = arith.addf %81, %83 : vector<16x64xf32>
    %85 = arith.addf %1, %84 : vector<16x64xf32>
    %cst_89 = arith.constant 0.000000e+00 : f32
    %86 = vector.broadcast %cst_89 : f32 to vector<16x64xf32>
    %87 = arith.cmpf ogt, %85, %86 : vector<16x64xf32>
    %cst_90 = arith.constant 0.00999999977 : f32
    %88 = vector.broadcast %cst_90 : f32 to vector<16x64xf32>
    %89 = arith.mulf %88, %85 : vector<16x64xf32>
    %90 = arith.select %87, %85, %89 : vector<16x64xi1>, vector<16x64xf32>
    %c0_91 = arith.constant 0 : index
    %c0_92 = arith.constant 0 : index
    %c0_93 = arith.constant 0 : index
    %91 = vector.load %arg10[%c0_91, %c0_92, %c0_93] : memref<1x16x64xf32, #tpu.memory_space<vmem>>, vector<1x16x64xf32>
    %92 = vector.shape_cast %91 : vector<1x16x64xf32> to vector<16x64xf32>
    %93 = vector.shape_cast %90 : vector<16x64xf32> to vector<1x16x64xf32>
    tpu.vector_store %arg10[%c0_91, %c0_92, %c0_93], %93 {strides = array<i32>} : memref<1x16x64xf32, #tpu.memory_space<vmem>>, vector<1x16x64xf32>,
    return
  }
  func.func @transform_0(%arg0: i32) -> (i32, i32, i32) {
    %c0_i32 = arith.constant 0 : i32
    %c0_i32_0 = arith.constant 0 : i32
    %c0_i32_1 = arith.constant 0 : i32
    return %arg0, %c0_i32, %c0_i32_0 : i32, i32, i32
  }
  func.func @transform_1(%arg0: i32) -> (i32, i32, i32) {
    %c0_i32 = arith.constant 0 : i32
    %c0_i32_0 = arith.constant 0 : i32
    %c0_i32_1 = arith.constant 0 : i32
    %c0_i32_2 = arith.constant 0 : i32
    return %c0_i32, %c0_i32_0, %c0_i32_1 : i32, i32, i32
  }
  func.func @transform_2(%arg0: i32) -> (i32, i32, i32) {
    %c0_i32 = arith.constant 0 : i32
    %c0_i32_0 = arith.constant 0 : i32
    %c0_i32_1 = arith.constant 0 : i32
    %c0_i32_2 = arith.constant 0 : i32
    return %c0_i32, %c0_i32_0, %c0_i32_1 : i32, i32, i32
  }
  func.func @transform_3(%arg0: i32) -> (i32, i32, i32) {
    %c0_i32 = arith.constant 0 : i32
    %c0_i32_0 = arith.constant 0 : i32
    %c0_i32_1 = arith.constant 0 : i32
    %c0_i32_2 = arith.constant 0 : i32
    return %c0_i32, %c0_i32_0, %c0_i32_1 : i32, i32, i32
  }
  func.func @transform_4(%arg0: i32) -> (i32, i32) {
    %c0_i32 = arith.constant 0 : i32
    %c0_i32_0 = arith.constant 0 : i32
    %c0_i32_1 = arith.constant 0 : i32
    return %c0_i32, %c0_i32_0 : i32, i32
  }
  func.func @transform_5(%arg0: i32) -> (i32, i32) {
    %c0_i32 = arith.constant 0 : i32
    %c0_i32_0 = arith.constant 0 : i32
    %c0_i32_1 = arith.constant 0 : i32
    return %c0_i32, %c0_i32_0 : i32, i32
  }
  func.func @transform_6(%arg0: i32) -> (i32, i32) {
    %c0_i32 = arith.constant 0 : i32
    %c0_i32_0 = arith.constant 0 : i32
    %c0_i32_1 = arith.constant 0 : i32
    return %c0_i32, %c0_i32_0 : i32, i32
  }
  func.func @transform_7(%arg0: i32) -> (i32, i32, i32) {
    %c0_i32 = arith.constant 0 : i32
    %c0_i32_0 = arith.constant 0 : i32
    %c0_i32_1 = arith.constant 0 : i32
    return %arg0, %c0_i32, %c0_i32_0 : i32, i32, i32
  }
  func.func @transform_8(%arg0: i32) -> (i32, i32, i32) {
    %c0_i32 = arith.constant 0 : i32
    %c0_i32_0 = arith.constant 0 : i32
    %c0_i32_1 = arith.constant 0 : i32
    return %arg0, %c0_i32, %c0_i32_0 : i32, i32, i32
  }
  func.func @transform_9(%arg0: i32) -> (i32, i32, i32) {
    %c0_i32 = arith.constant 0 : i32
    %c0_i32_0 = arith.constant 0 : i32
    %c0_i32_1 = arith.constant 0 : i32
    return %arg0, %c0_i32, %c0_i32_0 : i32, i32, i32
  }
}

</mosaic_0001>

<bundles_post_ra>
// kernel: lightweight_forward.1
= control target key start
LH: loop header
LB: loop body
LE: loop exit
PB: predicated region body
PF: predicated region fallthrough
CT: control target
= control target key end

     0   :  { %s2185_s30 = smov 0   ;;  %s2559_s0 = inlined_call_operand.vmem [shape: f32[2,16,64], index: 0, kind: input, shape index: {}]   ;;  %s2560_s1 = inlined_call_operand.vmem [shape: bf16[3,64,128], index: 1, kind: input, shape index: {}]   ;;  %s2561_s2 = inlined_call_operand.vmem [shape: bf16[3,128,128], index: 2, kind: input, shape index: {}]   ;;  %s2562_s3 = inlined_call_operand.vmem [shape: bf16[3,128,64], index: 3, kind: input, shape index: {}]   ;;  %s2563_s4 = inlined_call_operand.vmem [shape: f32[1,128], index: 4, kind: input, shape index: {}]   ;;  %s2564_s5 = inlined_call_operand.vmem [shape: f32[1,128], index: 5, kind: input, shape index: {}]   ;;  %s2565_s6 = inlined_call_operand.vmem [shape: f32[1,64], index: 6, kind: input, shape index: {}]   ;;  %s2566_s7 = inlined_call_operand.vmem [shape: f32[2,16,128], index: 7, kind: output, shape index: {0}]   ;;  %s2567_s8 = inlined_call_operand.vmem [shape: f32[2,16,64], index: 8, kind: output, shape index: {1}]   ;;  %s2568_s9 = inlined_call_operand.vmem [shape: f32[2,16,64], index: 9, kind: output, shape index: {2}]  }
   0x1 LB: > { %s1635_s10 = sadd.s32 4294967295, %s2131_s30   ;;  %p1639_p0 = scmp.ge.s32.totalorder %s2131_s30, 1  ;;  %s2131_s30 = sphi %s2185_s30, %s20_s30  }
   0x2   : > { %p292_p1 = scmp.lt.s32.totalorder %s2131_s30, 3 }
   0x4   : > { %p293_p2 = pnand %p1639_p0, %p292_p1 }
   0x5   : > { %v2056_v0 = vld [vmem:[%s2560_s1 + $0x20] sm:$0xff] (!%p293_p2)   ;;  %v2133_v1 = vmov (!%p293_p2), 0.0   ;;  %v2058_v3 = vld [vmem:[%s2560_s1 + $0x28] sm:$0xff] (!%p293_p2)   ;;  %vm2134_vm0 = vmmov (!%p293_p2), 0   ;;  %p338_p3 = scmp.lt.s32.totalorder (!%p293_p2), %s1635_s10, 1  ;;  %vm361_vm1 = vcmask (!%p293_p2), 516096  }
   0x6   : > { %296 = sbr.rel (%p293_p2) target bundleno = 841 (0x349), region = 48  ;;  %1890 = vmatprep.subr.bf16.mxu0 (!%p293_p2), %v2133_v1  ;;  %1902 = vmatprep.subr.bf16.mxu1 (!%p293_p2), %v2133_v1  ;;  %v2057_v2 = vld [vmem:[%s2560_s1] sm:$0xff] (!%p293_p2)   ;;  %v2059_v4 = vld [vmem:[%s2560_s1 + $0x8] sm:$0xff] (!%p293_p2)   ;;  %v2060_v5 = vld [vmem:[%s2560_s1 + $0x30] sm:$0xff] (!%p293_p2)   ;;  %vm362_vm2 = vsmask.f32 (!%p293_p2), 256 }
   0x7   : > { %1891 = vmatpush3.bf16.msra.mxu0 (!%p293_p2), %v2056_v0  ;;  %1898 = vmatprep.mubr.msk.bf16.mxu0 (!%p293_p2), %vm2134_vm0, %v2133_v1  ;;  %v2061_v6 = vld [vmem:[%s2560_s1 + $0x10] sm:$0xff] (!%p293_p2)   ;;  %v364_v9 = vld [vmem:[#allocation2] sm:$0x1] (!%p293_p2)  ;;  %v2062_v10 = vld [vmem:[%s2560_s1 + $0x38] sm:$0xff] (!%p293_p2)   ;;  %vm367_vm4 = vsmask.f32 (!%p293_p2), 7938 }
   0x8   : > { %1903 = vmatpush3.bf16.msra.mxu1 (!%p293_p2), %v2057_v2  ;;  %1892 = vmatprep.subr.bf16.mxu0 (!%p293_p2), %v2133_v1  ;;  %vm2236_vm3 = vmand (!%p293_p2), %vm361_vm1, %vm362_vm2  ;;  %v369_v12 = vld [vmem:[#allocation2 + $0x8] sm:$0x1] (!%p293_p2)  ;;  %v2063_v15 = vld [vmem:[%s2560_s1 + $0x18] sm:$0xff] (!%p293_p2)   ;;  %vm378_vm6 = vsmask.f32 (!%p293_p2), 4368  ;;  %vm400_vm7 = vcmask (!%p293_p2), 519168  }
   0x9   : > { %1904 = vmatprep.subr.bf16.mxu1 (!%p293_p2), %v2133_v1  ;;  %1910 = vmatprep.mubr.msk.bf16.mxu1 (!%p293_p2), %vm2134_vm0, %v2133_v1  ;;  %v365_v16 = vsel (!%p293_p2), %vm2236_vm3, 0, %v364_v9  ;;  %vm368_vm5 = vmand (!%p293_p2), %vm361_vm1, %vm367_vm4  ;;  %vm475_vm10 = vcmask (!%p293_p2), 523264   ;;  %vm438_vm11 = vsmask.f32 (!%p293_p2), 7424  ;;  %v2066_v47 = vld [vmem:[%s2560_s1 + $0x40] sm:$0xff] (!%p293_p2)   ;;  %v2067_v50 = vld [vmem:[%s2560_s1 + $0x48] sm:$0xff] (!%p293_p2)  }
   0xa   : > { %366 = vst [vmem:[#allocation2] sm:$0x1] (!%p293_p2), %v365_v16  ;;  %v370_v17 = vsel (!%p293_p2), %vm368_vm5, 0, %v369_v12  ;;  %vm2254_vm8 = vmor (!%p293_p2), %vm362_vm2, %vm378_vm6  ;;  %vm600_vm12 = vcmask (!%p293_p2), 1046528   ;;  %v2068_v51 = vld [vmem:[%s2560_s1 + $0x50] sm:$0xff] (!%p293_p2)   ;;  %v2069_v52 = vld [vmem:[%s2560_s1 + $0x58] sm:$0xff] (!%p293_p2)  }
   0xb   : > { %1893 = vmatpush3.bf16.msra.mxu0 (!%p293_p2), %v2058_v3  ;;  %371 = vst [vmem:[#allocation2 + $0x8] sm:$0x1] (!%p293_p2), %v370_v17  ;;  %vm401_vm9 = vmand (!%p293_p2), %vm400_vm7, %vm367_vm4  ;;  %v2071_v54 = vld [vmem:[%s2561_s2] sm:$0xff] (!%p293_p2)   ;;  %v2072_v55 = vld [vmem:[%s2561_s2 + $0x8] sm:$0xff] (!%p293_p2)   ;;  %vm691_vm13 = vcmask (!%p293_p2), 1040384  }
   0xc   : > { %1905 = vmatpush3.bf16.msra.mxu1 (!%p293_p2), %v2059_v4  ;;  %1894 = vmatprep.subr.bf16.mxu0 (!%p293_p2), %v2133_v1  ;;  %v2073_v56 = vld [vmem:[%s2561_s2 + $0x40] sm:$0xff] (!%p293_p2)   ;;  %v2074_v57 = vld [vmem:[%s2561_s2 + $0x10] sm:$0xff] (!%p293_p2)   ;;  %vm2308_vm14 = vmand (!%p293_p2), %vm691_vm13, %vm362_vm2 }
   0xd   : > { %s2580_s10 = smov (!%p338_p3, %s1635_s10), 1  ;;  %1906 = vmatprep.subr.bf16.mxu1 %v2133_v1  ;;  %v693_v59 = vld [vmem:[#allocation3] sm:$0x1]  ;;  %vm2319_vm15 = vmand %vm691_vm13, %vm367_vm4  ;;  %v697_v63 = vld [vmem:[#allocation3 + $0x8] sm:$0x1] }
   0xe   : > { %s2216_s21 = sshll.u32 %s2580_s10, 4  ;;  %v2075_v60 = vld [vmem:[%s2561_s2 + $0x48] sm:$0xff]   ;;  %v694_v61 = vsel %vm2308_vm14, 0, %v693_v59  ;;  %v2076_v0 = vld [vmem:[%s2561_s2 + $0x18] sm:$0xff]   ;;  %v698_v2 = vsel %vm2319_vm15, 0, %v697_v63  ;;  %v2077_v3 = vld [vmem:[%s2561_s2 + $0x50] sm:$0xff]  }
   0xf   : > { %s342_s26 = scalar_lea.vmem %s2559_s0, %s2216_s21  ;;  %1895 = vmatpush3.bf16.msra.mxu0 %v2060_v5  ;;  %695 = vst [vmem:[#allocation3] sm:$0x1] %v694_v61  ;;  %699 = vst [vmem:[#allocation3 + $0x8] sm:$0x1] %v698_v2  ;;  %v2078_v4 = vld [vmem:[%s2561_s2 + $0x20] sm:$0xff]   ;;  %v2079_v5 = vld [vmem:[%s2561_s2 + $0x58] sm:$0xff]   ;;  %s347_s17 = scalar_lea.vmem %s2566_s7, %s2216_s21 }
  0x10   : > { %v2227_v7 = vld [vmem:[%s342_s26] sm:$0xff]  ;;  %v2229_v8 = vld [vmem:[%s342_s26 + $0x8] sm:$0xff]  ;;  %1907 = vmatpush3.bf16.msra.mxu1 %v2061_v6  ;;  %1896 = vmatprep.subr.bf16.mxu0 %v2133_v1  ;;  %v2084_v12 = vld [vmem:[%s2561_s2 + $0x38] sm:$0xff]   ;;  %s352_s13 = scalar_lea.vmem %s2567_s8, %s2216_s21  ;;  %s357_s15 = scalar_lea.vmem %s2568_s9, %s2216_s21 }
  0x11   : > { %v1815_v13 = vpack.c.bf16 %v2227_v7, %v2227_v7  ;;  %v1816_v14 = vpack.c.bf16 %v2229_v8, %v2229_v8  ;;  %1908 = vmatprep.subr.bf16.mxu1 %v2133_v1  ;;  %v402_v30 = vld [vmem:[#allocation2] sm:$0xf]  ;;  %v2080_v6 = vld [vmem:[%s2561_s2 + $0x28] sm:$0xff]   ;;  %v2106_v62 = vld [vmem:[%s2562_s3 + $0x58] sm:$0xff]  }
  0x12   : > { %v407_v32 = vld [vmem:[#allocation2 + $0x8] sm:$0x1]  ;;  %v2081_v9 = vld [vmem:[%s2561_s2 + $0x60] sm:$0xff]  }
  0x13   : > { %v381_v18 = vshrl.u32 %v1815_v13, 16  ;;  %v384_v19 = vshll.u32 %v1815_v13, 16  ;;  %v389_v20 = vshrl.u32 %v1816_v14, 16  ;;  %v392_v21 = vshll.u32 %v1816_v14, 16  ;;  %1897 = vmatpush3.bf16.msra.mxu0 %v2062_v10  ;;  %v2082_v10 = vld [vmem:[%s2561_s2 + $0x30] sm:$0xff]   ;;  %v2083_v11 = vld [vmem:[%s2561_s2 + $0x68] sm:$0xff]  }
  0x14   : > { %1909 = vmatpush3.bf16.msra.mxu1 %v2063_v15  ;;  %1914 = vmatprep.subr.bf16.mxu0 %v2133_v1  ;;  %v2085_v13 = vld [vmem:[%s2561_s2 + $0x70] sm:$0xff]   ;;  %v2087_v14 = vld [vmem:[%s2561_s2 + $0x78] sm:$0xff]   ;;  %v2116_v22 = vld [vmem:[%s2562_s3 + $0x80] sm:$0xff]  }
  0x15   : > { %v383_v23 = vrot.slane %v381_v18, 7  ;;  %v391_v24 = vrot.slane %v389_v20, 7  ;;  %1926 = vmatprep.subr.bf16.mxu1 %v2133_v1 }
  0x17   : > { %v386_v25 = vor.u32 %v384_v19, %v383_v23  ;;  %v387_v26 = vrot.slane %v383_v23, 4  ;;  %v394_v27 = vor.u32 %v392_v21, %v391_v24  ;;  %v396_v28 = vrot.slane %v391_v24, 4 }
  0x19   : > { %v395_v29 = vsel %vm2254_vm8, %v387_v26, %v394_v27  ;;  %v403_v31 = vsel %vm401_vm9, %v386_v25, %v402_v30  ;;  %v408_v33 = vsel %vm2236_vm3, %v396_v28, %v407_v32  ;;  %v1684_v27 = vld [vmem:[%s2563_s4] ss:$0 sm:$0xff]  ;;  %vm726_vm3 = vcmask 1043456  }
  0x1a   : > { %406 = vst.msk [vmem:[#allocation2 + $0x4] sm:$0xf] %vm400_vm7, %v395_v29  ;;  %404 = vst [vmem:[#allocation2] sm:$0xf] %v403_v31 }
  0x1b   : > { %409 = vst [vmem:[#allocation2 + $0x8] sm:$0x1] %v408_v33  ;;  %vm2378_vm5 = vmand %vm726_vm3, %vm367_vm4 }
  0x21   : > { %v411_v34 = vld [vmem:[#allocation2 + $0x4] sm:$0xf]  ;;  %v410_v35 = vld [vmem:[#allocation2] sm:$0xf] }
  0x22   : > { %v587_v36 = vld [vmem:[#allocation2] sm:$0xe]  ;;  %v1658_v37 = vcombine.low %v410_v35, %v411_v34  ;;  %v2065_v38 = vld [vmem:[#allocation2 + $0x8] ss:$0 sps:$4 sm:$0x11]  }
  0x23   : > { %v1678_v39 = vcombine.low %v587_v36, %v411_v34  ;;  %v447_v42 = vshll.u32 %v2065_v38, 16  ;;  %v602_v44 = vrot.slane %v2065_v38, 1 }
  0x24   : > { %v440_v40 = vshrl.u32 %v1658_v37, 16  ;;  %v442_v41 = vshll.u32 %v1658_v37, 16  ;;  %1911 = vmatmul.mubr.msk.bf16.vlgmr.msra.gmra.mrb[0].mxu1 %vm475_vm10, %v1658_v37 }
  0x25   : > { %v601_v43 = vrot.slane %v1678_v39, 1  ;;  %1942 = vmatprep.mubr.msk.bf16.mxu1 %vm2134_vm0, %v2133_v1  ;;  %v449_v46 = vrot.slane %v447_v42, 1  ;;  %1927 = vmatpush3.bf16.msra.mxu1 %v2073_v56 }
  0x26   : > { %v444_v45 = vrot.slane %v442_v41, 1  ;;  %1928 = vmatprep.subr.bf16.mxu1 %v2133_v1 }
  0x27   : > { %v603_v53 = vsel %vm600_vm12, %v601_v43, %v602_v44 }
  0x28   : > { %v445_v48 = vor.u32 %v444_v45, %v440_v40 }
  0x29   : > { %1929 = vmatpush3.bf16.msra.mxu1 %v2075_v60 }
  0x2a   : > { %v450_v49 = vsel %vm438_vm11, %v445_v48, %v449_v46  ;;  %1930 = vmatprep.subr.bf16.mxu1 %v2133_v1  ;;  %v728_v46 = vld [vmem:[#allocation3] sm:$0xf] }
  0x2b   : > { %1899 = vmatmul.mubr.msk.bf16.vlgmr.msra.gmra.mrb[0].mxu0 %vm475_vm10, %v450_v49 }
  0x2c   : > { %1915 = vmatpush3.bf16.msra.mxu0 %v2066_v47  ;;  %1922 = vmatprep.mubr.msk.bf16.mxu0 %vm2134_vm0, %v2133_v1 }
  0x2d   : > { %1916 = vmatprep.subr.bf16.mxu0 %v2133_v1  ;;  %1931 = vmatpush3.bf16.msra.mxu1 %v2077_v3 }
  0x2e   : > { %1932 = vmatprep.subr.bf16.mxu1 %v2133_v1 }
  0x30   : > { %1917 = vmatpush3.bf16.msra.mxu0 %v2067_v50  ;;  %v732_v50 = vld [vmem:[#allocation3 + $0x8] sm:$0x1] }
  0x31   : > { %1918 = vmatprep.subr.bf16.mxu0 %v2133_v1  ;;  %1933 = vmatpush3.bf16.msra.mxu1 %v2079_v5 }
  0x32   : > { %1934 = vmatprep.subr.bf16.mxu1 %v2133_v1 }
  0x34   : > { %1919 = vmatpush3.bf16.msra.mxu0 %v2068_v51 }
  0x35   : > { %1920 = vmatprep.subr.bf16.mxu0 %v2133_v1  ;;  %1935 = vmatpush3.bf16.msra.mxu1 %v2081_v9 }
  0x36   : > { %1936 = vmatprep.subr.bf16.mxu1 %v2133_v1 }
  0x38   : > { %1921 = vmatpush3.bf16.msra.mxu0 %v2069_v52 }
  0x39   : > { %1946 = vmatprep.subr.bf16.mxu0 %v2133_v1  ;;  %1937 = vmatpush3.bf16.msra.mxu1 %v2083_v11  ;;  %v2091_v11 = vld [vmem:[%s2561_s2 + $0x90] sm:$0xff]  }
  0x3a   : > { %1938 = vmatprep.subr.bf16.mxu1 %v2133_v1 }
  0x3b   : > { %1923 = vmatmul.mubr.msk.bf16.vlgmr.msra.gmra.mrb[4].mxu0 %vm475_vm10, %v603_v53 }
  0x3c   : > { %1962 = vmatprep.mubr.msk.bf16.mxu0 %vm2134_vm0, %v2133_v1  ;;  %1947 = vmatpush3.bf16.msra.mxu0 %v2071_v54 }
  0x3d   : > { %1948 = vmatprep.subr.bf16.mxu0 %v2133_v1  ;;  %1939 = vmatpush3.bf16.msra.mxu1 %v2085_v13  ;;  %v2093_v13 = vld [vmem:[%s2561_s2 + $0xa0] sm:$0xff]  }
  0x3e   : > { %1940 = vmatprep.subr.bf16.mxu1 %v2133_v1 }
  0x40   : > { %1949 = vmatpush3.bf16.msra.mxu0 %v2072_v55 }
  0x41   : > { %1950 = vmatprep.subr.bf16.mxu0 %v2133_v1  ;;  %1941 = vmatpush3.bf16.msra.mxu1 %v2087_v14  ;;  %v2094_v14 = vld [vmem:[%s2561_s2 + $0xa8] sm:$0xff]  }
  0x42   : > { %1966 = vmatprep.subr.bf16.mxu1 %v2133_v1 }
  0x44   : > { %1951 = vmatpush3.bf16.msra.mxu0 %v2074_v57 }
  0x45   : > { %1952 = vmatprep.subr.bf16.mxu0 %v2133_v1 }
  0x48   : > { %1953 = vmatpush3.bf16.msra.mxu0 %v2076_v0 }
  0x49   : > { %1954 = vmatprep.subr.bf16.mxu0 %v2133_v1 }
  0x4c   : > { %1955 = vmatpush3.bf16.msra.mxu0 %v2078_v4 }
  0x4d   : > { %1956 = vmatprep.subr.bf16.mxu0 %v2133_v1 }
  0x50   : > { %1957 = vmatpush3.bf16.msra.mxu0 %v2080_v6  ;;  %v2089_v6 = vld [vmem:[%s2561_s2 + $0x80] sm:$0xff]  }
  0x51   : > { %1958 = vmatprep.subr.bf16.mxu0 %v2133_v1 }
  0x54   : > { %1959 = vmatpush3.bf16.msra.mxu0 %v2082_v10  ;;  %v2090_v10 = vld [vmem:[%s2561_s2 + $0x88] sm:$0xff]  }
  0x55   : > { %1960 = vmatprep.subr.bf16.mxu0 %v2133_v1 }
  0x58   : > { %1961 = vmatpush3.bf16.msra.mxu0 %v2084_v12  ;;  %v2092_v12 = vld [vmem:[%s2561_s2 + $0x98] sm:$0xff]  }
  0x59   : > { %1986 = vmatprep.subr.bf16.mxu0 %v2133_v1 }
  0xf7   : > { %v580_v15 = vpop.f32.mrb[0].mxu1 }
  0xf8   : > { %v1912_v16 = vpop.f32.mrb[1].mxu1 }
  0xf9   : > { %v583_v17 = vpop.f32.mrb[2].mxu1 }
  0xfa   : > { %v1913_v18 = vpop.f32.mrb[3].mxu1 }
  0xfb   : > { %v2096_v18 = vld [vmem:[%s2561_s2 + $0xb8] sm:$0xff]  }
  0xfe   : > { %v513_v19 = vpop.f32.mrb[0].mxu0 }
  0xff   : > { %v581_v20 = vadd.f32 %v580_v15, %v513_v19  ;;  %v1900_v21 = vpop.f32.mrb[1].mxu0  ;;  %v2095_v15 = vld [vmem:[%s2561_s2 + $0xb0] sm:$0xff]  }
 0x100   : > { %v516_v23 = vpop.f32.mrb[2].mxu0 }
 0x101   : > { %v584_v24 = vadd.f32 %v583_v17, %v516_v23  ;;  %v1901_v25 = vpop.f32.mrb[3].mxu0  ;;  %v2098_v23 = vld [vmem:[%s2562_s3] sm:$0xff]  }
 0x102   : > { %v2100_v25 = vld [vmem:[%s2562_s3 + $0x40] sm:$0xff]  }
 0x10e   : > { %v665_v26 = vpop.f32.mrb[4].mxu0 }
 0x10f   : > { %v672_v28 = vadd.f32 %v665_v26, %v581_v20  ;;  %v1924_v29 = vpop.f32.mrb[5].mxu0  ;;  %v2101_v26 = vld [vmem:[%s2562_s3 + $0x10] sm:$0xff]  }
 0x110   : > { %v668_v30 = vpop.f32.mrb[6].mxu0 }
 0x111   : > { %v681_v31 = vadd.f32 %v1684_v27, %v672_v28  ;;  %v673_v32 = vadd.f32 %v668_v30, %v584_v24  ;;  %v1925_v33 = vpop.f32.mrb[7].mxu0  ;;  %v2099_v24 = vld [vmem:[%s2562_s3 + $0x8] sm:$0xff]   ;;  %v1107_v30 = vld [vmem:[#allocation4 + $0x8] sm:$0x1] }
 0x112   : > { %v2102_v28 = vld [vmem:[%s2562_s3 + $0x48] sm:$0xff]   ;;  %v2104_v33 = vld [vmem:[%s2562_s3 + $0x50] sm:$0xff]  }
 0x113   : > { %vm683_vm1 = vcmp.gt.f32.partialorder %v681_v31, 0.0  ;;  %v685_v34 = vmul.f32 0.01, %v681_v31  ;;  %v682_v35 = vadd.f32 %v1684_v27, %v673_v32  ;;  %v1104_v27 = vld [vmem:[#allocation4] sm:$0x1]  ;;  %v1108_v32 = vsel %vm2319_vm15, 0, %v1107_v30 }
 0x114   : > { %v1105_v29 = vsel %vm2308_vm14, 0, %v1104_v27  ;;  %1109 = vst [vmem:[#allocation4 + $0x8] sm:$0x1] %v1108_v32 }
 0x115   : > { %v687_v36 = vsel %vm683_vm1, %v681_v31, %v685_v34  ;;  %vm684_vm2 = vcmp.gt.f32.partialorder %v682_v35, 0.0  ;;  %v686_v37 = vmul.f32 0.01, %v682_v35  ;;  %1106 = vst [vmem:[#allocation4] sm:$0x1] %v1105_v29  ;;  %v2103_v31 = vld [vmem:[%s2562_s3 + $0x18] sm:$0xff]  }
 0x116   : > { %689 = vst [vmem:[%s347_s17] sm:$0xff] %v687_v36  ;;  %v1817_v38 = vpack.c.bf16 %v687_v36, %v687_v36  ;;  %v2105_v34 = vld [vmem:[%s2562_s3 + $0x20] sm:$0xff]  }
 0x117   : > { %v688_v39 = vsel %vm684_vm2, %v682_v35, %v686_v37  ;;  %v2107_v35 = vld [vmem:[%s2562_s3 + $0x28] sm:$0xff]   ;;  %v2108_v36 = vld [vmem:[%s2562_s3 + $0x60] sm:$0xff]   ;;  %v2109_v37 = vld [vmem:[%s2562_s3 + $0x30] sm:$0xff]  }
 0x118   : > { %v707_v40 = vshrl.u32 %v1817_v38, 16  ;;  %690 = vst [vmem:[%s347_s17 + $0x8] sm:$0xff] %v688_v39  ;;  %v1818_v41 = vpack.c.bf16 %v688_v39, %v688_v39  ;;  %v710_v43 = vshll.u32 %v1817_v38, 16  ;;  %v2110_v38 = vld [vmem:[%s2562_s3 + $0x68] sm:$0xff]   ;;  %v2111_v39 = vld [vmem:[%s2562_s3 + $0x38] sm:$0xff]  }
 0x11a   : > { %v709_v42 = vrot.slane %v707_v40, 7  ;;  %v715_v44 = vshrl.u32 %v1818_v41, 16  ;;  %v718_v49 = vshll.u32 %v1818_v41, 16  ;;  %v2112_v40 = vld [vmem:[%s2562_s3 + $0x70] sm:$0xff]   ;;  %v2114_v41 = vld [vmem:[%s2562_s3 + $0x78] sm:$0xff]  }
 0x11c   : > { %v712_v47 = vor.u32 %v710_v43, %v709_v42  ;;  %v717_v48 = vrot.slane %v715_v44, 7  ;;  %v713_v51 = vrot.slane %v709_v42, 4 }
 0x11e   : > { %v729_v52 = vsel %vm2378_vm5, %v712_v47, %v728_v46  ;;  %v720_v53 = vor.u32 %v718_v49, %v717_v48  ;;  %v722_v54 = vrot.slane %v717_v48, 4 }
 0x11f   : > { %730 = vst [vmem:[#allocation3] sm:$0xf] %v729_v52 }
 0x120   : > { %v721_v55 = vsel %vm2254_vm8, %v713_v51, %v720_v53  ;;  %v733_v56 = vsel %vm2308_vm14, %v722_v54, %v732_v50  ;;  %v1746_v54 = vld [vmem:[%s2564_s5] ss:$0 sm:$0xff] }
 0x121   : > { %731 = vst [vmem:[#allocation3 + $0x4] sm:$0xf] %v721_v55  ;;  %734 = vst [vmem:[#allocation3 + $0x8] sm:$0x1] %v733_v56 }
 0x126   : > { %v735_v57 = vld [vmem:[#allocation3] sm:$0xf] }
 0x127   : > { %v971_v16 = vld [vmem:[#allocation3] sm:$0xe] }
 0x128   : > { %v736_v59 = vld [vmem:[#allocation3 + $0x4] sm:$0xf]  ;;  %v2088_v61 = vld [vmem:[#allocation3 + $0x8] ss:$0 sps:$4 sm:$0x11]  }
 0x129   : > { %v1703_v60 = vcombine.low %v735_v57, %v736_v59  ;;  %v787_v0 = vshll.u32 %v2088_v61, 16  ;;  %v1737_v17 = vcombine.low %v971_v16, %v736_v59  ;;  %v993_v20 = vrot.slane %v2088_v61, 1 }
 0x12b   : > { %1963 = vmatmul.mubr.bf16.vlgmr.msra.gmra.mrb[8].mxu0 %v1703_v60  ;;  %v782_v63 = vshll.u32 %v1703_v60, 16  ;;  %v780_v2 = vshrl.u32 %v1703_v60, 16  ;;  %v789_v5 = vrot.slane %v787_v0, 1  ;;  %v992_v19 = vrot.slane %v1737_v17, 1  ;;  %v1140_v17 = vld [vmem:[#allocation4 + $0x8] sm:$0x1] }
 0x12c   : > { %2002 = vmatprep.mubr.msk.bf16.mxu0 %vm2134_vm0, %v2133_v1  ;;  %1987 = vmatpush3.bf16.msra.mxu0 %v2100_v25 }
 0x12d   : > { %v784_v3 = vrot.slane %v782_v63, 1  ;;  %v994_v21 = vsel %vm600_vm12, %v992_v19, %v993_v20  ;;  %1988 = vmatprep.subr.bf16.mxu0 %v2133_v1 }
 0x12f   : > { %v785_v4 = vor.u32 %v784_v3, %v780_v2 }
 0x130   : > { %1989 = vmatpush3.bf16.msra.mxu0 %v2102_v28 }
 0x131   : > { %v790_v9 = vsel %vm438_vm11, %v785_v4, %v789_v5  ;;  %1990 = vmatprep.subr.bf16.mxu0 %v2133_v1 }
 0x132   : > { %1943 = vmatmul.mubr.bf16.vlgmr.msra.gmra.mrb[4].mxu1 %v790_v9 }
 0x133   : > { %1967 = vmatpush3.bf16.msra.mxu1 %v2089_v6  ;;  %1982 = vmatprep.mubr.msk.bf16.mxu1 %vm2134_vm0, %v2133_v1 }
 0x134   : > { %1968 = vmatprep.subr.bf16.mxu1 %v2133_v1  ;;  %1991 = vmatpush3.bf16.msra.mxu0 %v2104_v33 }
 0x135   : > { %1992 = vmatprep.subr.bf16.mxu0 %v2133_v1 }
 0x137   : > { %1969 = vmatpush3.bf16.msra.mxu1 %v2090_v10 }
 0x138   : > { %1970 = vmatprep.subr.bf16.mxu1 %v2133_v1  ;;  %1993 = vmatpush3.bf16.msra.mxu0 %v2106_v62  ;;  %v2118_v62 = vld [vmem:[%s2562_s3 + $0x90] sm:$0xff]  }
 0x139   : > { %1994 = vmatprep.subr.bf16.mxu0 %v2133_v1 }
 0x13b   : > { %1971 = vmatpush3.bf16.msra.mxu1 %v2091_v11 }
 0x13c   : > { %1972 = vmatprep.subr.bf16.mxu1 %v2133_v1  ;;  %1995 = vmatpush3.bf16.msra.mxu0 %v2108_v36  ;;  %v2120_v36 = vld [vmem:[%s2562_s3 + $0xa0] sm:$0xff]  }
 0x13d   : > { %1996 = vmatprep.subr.bf16.mxu0 %v2133_v1 }
 0x13f   : > { %1973 = vmatpush3.bf16.msra.mxu1 %v2092_v12 }
 0x140   : > { %1974 = vmatprep.subr.bf16.mxu1 %v2133_v1  ;;  %1997 = vmatpush3.bf16.msra.mxu0 %v2110_v38  ;;  %v2122_v38 = vld [vmem:[%s2562_s3 + $0xb0] sm:$0xff]  }
 0x141   : > { %1998 = vmatprep.subr.bf16.mxu0 %v2133_v1 }
 0x143   : > { %1975 = vmatpush3.bf16.msra.mxu1 %v2093_v13  ;;  %v1136_v13 = vld [vmem:[#allocation4] sm:$0xf] }
 0x144   : > { %1976 = vmatprep.subr.bf16.mxu1 %v2133_v1  ;;  %1999 = vmatpush3.bf16.msra.mxu0 %v2112_v40 }
 0x145   : > { %2000 = vmatprep.subr.bf16.mxu0 %v2133_v1 }
 0x147   : > { %1977 = vmatpush3.bf16.msra.mxu1 %v2094_v14 }
 0x148   : > { %1978 = vmatprep.subr.bf16.mxu1 %v2133_v1  ;;  %2001 = vmatpush3.bf16.msra.mxu0 %v2114_v41  ;;  %v2123_v41 = vld [vmem:[%s2562_s3 + $0xb8] sm:$0xff]  }
 0x149   : > { %2026 = vmatprep.subr.bf16.mxu0 %v2133_v1 }
 0x14b   : > { %1979 = vmatpush3.bf16.msra.mxu1 %v2095_v15 }
 0x14c   : > { %1980 = vmatprep.subr.bf16.mxu1 %v2133_v1 }
 0x14f   : > { %1981 = vmatpush3.bf16.msra.mxu1 %v2096_v18 }
 0x150   : > { %2006 = vmatprep.subr.bf16.mxu1 %v2133_v1 }
 0x152   : > { %1983 = vmatmul.mubr.bf16.vlgmr.msra.gmra.mrb[8].mxu1 %v994_v21 }
 0x153   : > { %2022 = vmatprep.mubr.msk.bf16.mxu1 %vm2134_vm0, %v2133_v1  ;;  %2007 = vmatpush3.bf16.msra.mxu1 %v2098_v23 }
 0x154   : > { %2008 = vmatprep.subr.bf16.mxu1 %v2133_v1 }
 0x157   : > { %2009 = vmatpush3.bf16.msra.mxu1 %v2099_v24 }
 0x158   : > { %2010 = vmatprep.subr.bf16.mxu1 %v2133_v1 }
 0x15b   : > { %2011 = vmatpush3.bf16.msra.mxu1 %v2101_v26 }
 0x15c   : > { %2012 = vmatprep.subr.bf16.mxu1 %v2133_v1 }
 0x15f   : > { %2013 = vmatpush3.bf16.msra.mxu1 %v2103_v31 }
 0x160   : > { %2014 = vmatprep.subr.bf16.mxu1 %v2133_v1 }
 0x163   : > { %2015 = vmatpush3.bf16.msra.mxu1 %v2105_v34  ;;  %v2117_v34 = vld [vmem:[%s2562_s3 + $0x88] sm:$0xff]  }
 0x164   : > { %2016 = vmatprep.subr.bf16.mxu1 %v2133_v1 }
 0x167   : > { %2017 = vmatpush3.bf16.msra.mxu1 %v2107_v35  ;;  %v2119_v35 = vld [vmem:[%s2562_s3 + $0x98] sm:$0xff]  }
 0x168   : > { %2018 = vmatprep.subr.bf16.mxu1 %v2133_v1 }
 0x16b   : > { %2019 = vmatpush3.bf16.msra.mxu1 %v2109_v37  ;;  %v2121_v37 = vld [vmem:[%s2562_s3 + $0xa8] sm:$0xff]  }
 0x16c   : > { %2020 = vmatprep.subr.bf16.mxu1 %v2133_v1 }
 0x16f   : > { %2021 = vmatpush3.bf16.msra.mxu1 %v2111_v39 }
 0x1fe   : > { %v964_v42 = vpop.f32.mrb[8].mxu0 }
 0x1ff   : > { %v1964_v43 = vpop.f32.mrb[9].mxu0 }
 0x200   : > { %v967_v44 = vpop.f32.mrb[10].mxu0 }
 0x201   : > { %v1965_v46 = vpop.f32.mrb[11].mxu0 }
 0x205   : > { %v874_v47 = vpop.f32.mrb[4].mxu1 }
 0x206   : > { %v965_v48 = vadd.f32 %v964_v42, %v874_v47  ;;  %v1944_v49 = vpop.f32.mrb[5].mxu1 }
 0x207   : > { %v877_v50 = vpop.f32.mrb[6].mxu1 }
 0x208   : > { %v968_v51 = vadd.f32 %v967_v44, %v877_v50  ;;  %v1945_v52 = vpop.f32.mrb[7].mxu1 }
 0x225   : > { %v1078_v53 = vpop.f32.mrb[8].mxu1 }
 0x226   : > { %v1085_v55 = vadd.f32 %v1078_v53, %v965_v48  ;;  %v1984_v56 = vpop.f32.mrb[9].mxu1 }
 0x227   : > { %v1081_v57 = vpop.f32.mrb[10].mxu1 }
 0x228   : > { %v1094_v59 = vadd.f32 %v1746_v54, %v1085_v55  ;;  %v1086_v60 = vadd.f32 %v1081_v57, %v968_v51  ;;  %v1985_v61 = vpop.f32.mrb[11].mxu1 }
 0x22a   : > { %vm1096_vm4 = vcmp.gt.f32.partialorder %v1094_v59, 0.0  ;;  %v1098_v63 = vmul.f32 0.01, %v1094_v59  ;;  %v1095_v0 = vadd.f32 %v1746_v54, %v1086_v60 }
 0x22c   : > { %v1100_v2 = vsel %vm1096_vm4, %v1094_v59, %v1098_v63  ;;  %vm1097_vm6 = vcmp.gt.f32.partialorder %v1095_v0, 0.0  ;;  %v1099_v3 = vmul.f32 0.01, %v1095_v0 }
 0x22d   : > { %1102 = vst.msk [vmem:[%s352_s13] sm:$0xff] %vm475_vm10, %v1100_v2  ;;  %v1819_v4 = vpack.c.bf16 %v1100_v2, %v1100_v2 }
 0x22e   : > { %v1101_v5 = vsel %vm1097_vm6, %v1095_v0, %v1099_v3 }
 0x22f   : > { %v1117_v6 = vshrl.u32 %v1819_v4, 16  ;;  %1103 = vst.msk [vmem:[%s352_s13 + $0x8] sm:$0xff] %vm475_vm10, %v1101_v5  ;;  %v1820_v9 = vpack.c.bf16 %v1101_v5, %v1101_v5  ;;  %v1120_v11 = vshll.u32 %v1819_v4, 16 }
 0x231   : > { %v1119_v10 = vrot.slane %v1117_v6, 7  ;;  %v1125_v12 = vshrl.u32 %v1820_v9, 16  ;;  %v1128_v16 = vshll.u32 %v1820_v9, 16 }
 0x233   : > { %v1122_v14 = vor.u32 %v1120_v11, %v1119_v10  ;;  %v1127_v15 = vrot.slane %v1125_v12, 7  ;;  %v1123_v18 = vrot.slane %v1119_v10, 4 }
 0x235   : > { %v1137_v19 = vsel %vm2378_vm5, %v1122_v14, %v1136_v13  ;;  %v1130_v20 = vor.u32 %v1128_v16, %v1127_v15  ;;  %v1132_v21 = vrot.slane %v1127_v15, 4 }
 0x236   : > { %1138 = vst [vmem:[#allocation4] sm:$0xf] %v1137_v19 }
 0x237   : > { %v1131_v23 = vsel %vm2254_vm8, %v1123_v18, %v1130_v20  ;;  %v1141_v24 = vsel %vm2308_vm14, %v1132_v21, %v1140_v17 }
 0x238   : > { %1139 = vst [vmem:[#allocation4 + $0x4] sm:$0xf] %v1131_v23  ;;  %1142 = vst [vmem:[#allocation4 + $0x8] sm:$0x1] %v1141_v24 }
 0x23d   : > { %v1143_v25 = vld [vmem:[#allocation4] sm:$0xf] }
 0x23e   : > { %v1379_v39 = vld [vmem:[#allocation4] sm:$0xe] }
 0x23f   : > { %v1144_v26 = vld [vmem:[#allocation4 + $0x4] sm:$0xf]  ;;  %v2115_v28 = vld [vmem:[#allocation4 + $0x8] ss:$0 sps:$4 sm:$0x11]  }
 0x240   : > { %v1765_v27 = vcombine.low %v1143_v25, %v1144_v26  ;;  %v1195_v30 = vshll.u32 %v2115_v28, 16  ;;  %v1799_v40 = vcombine.low %v1379_v39, %v1144_v26  ;;  %v1401_v43 = vrot.slane %v2115_v28, 1 }
 0x242   : > { %2023 = vmatmul.mubr.bf16.vlgmr.msra.gmra.mrb[12].mxu1 %v1765_v27  ;;  %v1190_v29 = vshll.u32 %v1765_v27, 16  ;;  %v1188_v45 = vshrl.u32 %v1765_v27, 16  ;;  %v1197_v33 = vrot.slane %v1195_v30, 1  ;;  %v1400_v42 = vrot.slane %v1799_v40, 1 }
 0x244   : > { %v1192_v31 = vrot.slane %v1190_v29, 1  ;;  %v1402_v44 = vsel %vm600_vm12, %v1400_v42, %v1401_v43 }
 0x246   : > { %v1193_v32 = vor.u32 %v1192_v31, %v1188_v45 }
 0x248   : > { %v1198_v58 = vsel %vm438_vm11, %v1193_v32, %v1197_v33 }
 0x249   : > { %2003 = vmatmul.mubr.bf16.vlgmr.msra.gmra.mrb[12].mxu0 %v1198_v58 }
 0x24a   : > { %2027 = vmatpush3.bf16.msra.mxu0 %v2116_v22  ;;  %2042 = vmatprep.mubr.msk.bf16.mxu0 %vm2134_vm0, %v2133_v1 }
 0x24b   : > { %2028 = vmatprep.subr.bf16.mxu0 %v2133_v1 }
 0x24e   : > { %2029 = vmatpush3.bf16.msra.mxu0 %v2117_v34 }
 0x24f   : > { %2030 = vmatprep.subr.bf16.mxu0 %v2133_v1 }
 0x252   : > { %2031 = vmatpush3.bf16.msra.mxu0 %v2118_v62 }
 0x253   : > { %2032 = vmatprep.subr.bf16.mxu0 %v2133_v1 }
 0x256   : > { %2033 = vmatpush3.bf16.msra.mxu0 %v2119_v35 }
 0x257   : > { %2034 = vmatprep.subr.bf16.mxu0 %v2133_v1 }
 0x25a   : > { %2035 = vmatpush3.bf16.msra.mxu0 %v2120_v36 }
 0x25b   : > { %2036 = vmatprep.subr.bf16.mxu0 %v2133_v1 }
 0x25e   : > { %2037 = vmatpush3.bf16.msra.mxu0 %v2121_v37 }
 0x25f   : > { %2038 = vmatprep.subr.bf16.mxu0 %v2133_v1 }
 0x262   : > { %2039 = vmatpush3.bf16.msra.mxu0 %v2122_v38 }
 0x263   : > { %2040 = vmatprep.subr.bf16.mxu0 %v2133_v1  ;;  %v1808_v1 = vld [vmem:[%s2565_s6] ss:$0 sm:$0xff] }
 0x266   : > { %2041 = vmatpush3.bf16.msra.mxu0 %v2123_v41 }
 0x269   : > { %2043 = vmatmul.mubr.bf16.vlgmr.msra.gmra.mrb[16].mxu0 %v1402_v44 }
 0x315   : > { %v1372_v46 = vpop.f32.mrb[12].mxu1 }
 0x316   : > { %v2024_v47 = vpop.f32.mrb[13].mxu1 }
 0x317   : > { %v1375_v48 = vpop.f32.mrb[14].mxu1 }
 0x318   : > { %v2025_v49 = vpop.f32.mrb[15].mxu1 }
 0x31c   : > { %v1282_v50 = vpop.f32.mrb[12].mxu0 }
 0x31d   : > { %v1373_v51 = vadd.f32 %v1372_v46, %v1282_v50  ;;  %v2004_v52 = vpop.f32.mrb[13].mxu0 }
 0x31e   : > { %v1285_v53 = vpop.f32.mrb[14].mxu0 }
 0x31f   : > { %v1376_v54 = vadd.f32 %v1375_v48, %v1285_v53  ;;  %v2005_v55 = vpop.f32.mrb[15].mxu0 }
 0x33c   : > { %v1486_v56 = vpop.f32.mrb[16].mxu0 }
 0x33d   : > { %v1493_v57 = vadd.f32 %v1486_v56, %v1373_v51  ;;  %v2044_v59 = vpop.f32.mrb[17].mxu0 }
 0x33e   : > { %v1489_v60 = vpop.f32.mrb[18].mxu0 }
 0x33f   : > { %v1502_v61 = vadd.f32 %v1808_v1, %v1493_v57  ;;  %v1494_v63 = vadd.f32 %v1489_v60, %v1376_v54  ;;  %v2045_v0 = vpop.f32.mrb[19].mxu0 }
 0x341   : > { %v1504_v2 = vadd.f32 %v1502_v61, %v2227_v7  ;;  %v1503_v3 = vadd.f32 %v1808_v1, %v1494_v63 }
 0x343   : > { %vm1506_vm0 = vcmp.gt.f32.partialorder %v1504_v2, 0.0  ;;  %v1508_v4 = vmul.f32 0.01, %v1504_v2  ;;  %v1505_v5 = vadd.f32 %v1503_v3, %v2229_v8 }
 0x345   : > { %v1510_v6 = vsel %vm1506_vm0, %v1504_v2, %v1508_v4  ;;  %vm1507_vm7 = vcmp.gt.f32.partialorder %v1505_v5, 0.0  ;;  %v1509_v9 = vmul.f32 0.01, %v1505_v5 }
 0x346   : > { %1512 = vst.msk [vmem:[%s357_s15] sm:$0xff] %vm475_vm10, %v1510_v6 }
 0x347   : > { %v1511_v10 = vsel %vm1507_vm7, %v1505_v5, %v1509_v9 }
 0x348   : > { %1513 = vst.msk [vmem:[%s357_s15 + $0x8] sm:$0xff] %vm475_vm10, %v1511_v10 }
 0x349 PF: > { %s20_s30 = sadd.s32 1, %s2131_s30  }
 0x34a   : > { %p17_p4 = scmp.ge.s32.totalorder %s20_s30, 4  }
 0x34c   :  { %19 = sbr.rel (!%p17_p4) target bundleno = 1 (0x1), region = 108 }

</bundles_post_ra>
